<compile_context>
chip_gen: v7x
topology: tpu7x:2x2x1
jax: 0.10.0
libtpu: 0.0.40
codegen_flags: <defaults>
</compile_context>

<pallas_src>
import functools

import jax
import jax.numpy as jnp
from jax.experimental import pallas as pl
from jax.experimental.pallas import tpu as pltpu

LN_EPS = 1e-5

# MXU is native bf16 on v5e/v6e/v7x; accumulation stays f32
# (preferred_element_type).  Gate math, cell state and LN stats stay f32.
MATMUL_DTYPE = jnp.bfloat16   # matmul operands (weights, x, h)
ACT_DTYPE = jnp.bfloat16      # stored activations: gates_x slab + layer outputs


# ---------------------------------------------------------------------------
# small helpers
# ---------------------------------------------------------------------------
def _round_up(x, m):
    return (x + m - 1) // m * m


def _largest_divisor(n, cap):
    for c in range(min(n, cap), 0, -1):
        if n % c == 0:
            return c
    return 1


@functools.lru_cache(maxsize=None)
def _physical_vmem_bytes():
    try:
        v = int(pltpu.get_tpu_info().vmem_capacity_bytes)
        if v >= (16 << 20):
            return v
    except Exception:
        pass
    return 64 << 20                       # conservative (v7x-sized) fallback


@functools.lru_cache(maxsize=None)
def _is_two_core_chip():
    """v7x exposes 2 TensorCores per chip; v5e/v6e expose 1."""
    try:
        kind = jax.devices()[0].device_kind.lower()
    except Exception:
        return False
    return ("v7" in kind) or ("tpu7" in kind)


def _vmem_limit(pipelined_bytes, resident_bytes=0):
    est = 2 * int(pipelined_bytes) + int(resident_bytes) + (4 << 20)
    cap = int(0.9 * _physical_vmem_bytes())     # ~115 MiB v5e/v6e, ~57 MiB v7x
    return int(min(max(est, 16 << 20), cap))


def _row_cap():
    return 1024 if _physical_vmem_bytes() >= (96 << 20) else 512


def _row_tiling(m):
    """Row tile and padded row count (pad instead of degrading to tiny tiles)."""
    tm = min(_row_cap(), _round_up(m, 8))
    return tm, _round_up(m, tm)


def _col_tile(n, cap=2048):
    """Largest multiple-of-128 divisor of n (n % 128 == 0), capped."""
    c = min(n, max(cap // 128 * 128, 128))
    while c > 128:
        if n % c == 0:
            return c
        c -= 128
    return min(n, 128)


def _time_chunk(t, cap=32):
    """Time-chunk size and padded T.  Prefer an exact divisor >= 8; otherwise
    pad T to a multiple of 16 so per-grid-step overhead stays amortized."""
    d = _largest_divisor(t, cap)
    if d >= 8 or d == t:
        return d, t
    return 16, _round_up(t, 16)


# ---------------------------------------------------------------------------
# Kernel 1/3: generic row/column-tiled  out = x @ W + b  (MXU, bf16 operands)
#   Used for the hoisted input projection (gates_x) and the final dense layer.
# ---------------------------------------------------------------------------
def matmul_bias_kernel(x_ref, w_ref, b_ref, o_ref):
    o_ref[...] = (jnp.dot(x_ref[...].astype(MATMUL_DTYPE), w_ref[...],
                          preferred_element_type=jnp.float32)
                  + b_ref[...]).astype(o_ref.dtype)


def input_proj(x2d, w_p, b_p):
    """x2d: (M, I); w_p: (I, 4*Hp) gate-packed bf16; b_p: (1, 4*Hp) f32.
    Returns gates_x (M, 4*Hp) in ACT_DTYPE."""
    M, I = x2d.shape
    N = w_p.shape[1]
    tm, M_pad = _row_tiling(M)
    cn = _col_tile(N)                       # bounds the weight block for v7x
    if M_pad != M:
        x2d = jnp.pad(x2d, ((0, M_pad - M), (0, 0)))
    limit = _vmem_limit(tm * I * x2d.dtype.itemsize + I * cn * 2
                        + cn * 4 + tm * cn * 2)
    out = pl.pallas_call(
        matmul_bias_kernel,
        out_shape=jax.ShapeDtypeStruct((M_pad, N), ACT_DTYPE),
        grid_spec=pltpu.PrefetchScalarGridSpec(
            num_scalar_prefetch=0,
            grid=(M_pad // tm, N // cn),
            in_specs=[
                pl.BlockSpec((tm, I), lambda m, n: (m, 0)),
                pl.BlockSpec((I, cn), lambda m, n: (0, n)),
                pl.BlockSpec((1, cn), lambda m, n: (0, n)),
            ],
            out_specs=pl.BlockSpec((tm, cn), lambda m, n: (m, n)),
        ),
        compiler_params=pltpu.CompilerParams(
            dimension_semantics=("parallel", "parallel"),
            vmem_limit_bytes=limit),
    )(x2d, w_p, b_p)
    return out[:M] if M_pad != M else out


def dense(x2d, w_p, b_p):
    """x2d: (M, Hp) bf16; w_p: (Hp, Op) bf16; b_p: (1, Op) f32 -> (M, Op) f32."""
    M, Hp = x2d.shape
    Op = w_p.shape[1]
    tm, M_pad = _row_tiling(M)
    if M_pad != M:
        x2d = jnp.pad(x2d, ((0, M_pad - M), (0, 0)))
    limit = _vmem_limit(tm * Hp * x2d.dtype.itemsize + Hp * Op * 2
                        + Op * 4 + tm * Op * 4)
    out = pl.pallas_call(
        matmul_bias_kernel,
        out_shape=jax.ShapeDtypeStruct((M_pad, Op), jnp.float32),
        grid_spec=pltpu.PrefetchScalarGridSpec(
            num_scalar_prefetch=0,
            grid=(M_pad // tm,),
            in_specs=[
                pl.BlockSpec((tm, Hp), lambda m: (m, 0)),
                pl.BlockSpec((Hp, Op), lambda m: (0, 0)),
                pl.BlockSpec((1, Op), lambda m: (0, 0)),
            ],
            out_specs=pl.BlockSpec((tm, Op), lambda m: (m, 0)),
        ),
        compiler_params=pltpu.CompilerParams(
            dimension_semantics=("parallel",),
            vmem_limit_bytes=limit),
    )(x2d, w_p, b_p)
    return out[:M] if M_pad != M else out


# ---------------------------------------------------------------------------
# Kernel 2: LSTM recurrence (+ fused LayerNorm), time-major.
#   Grid = (batch_blocks ["parallel"], time_chunks ["arbitrary"]).
#   Per time step: one fused (bblk, Hp) @ (Hp, 4*Hp) matmul + precomputed
#   gates_x; per-gate splits at lane-aligned offsets g*Hp.
#   W_hh^T (gate-packed) lives in HBM (pl.ANY), staged once per batch block
#   into a single-buffered VMEM scratch.  (h, c) carry lives in VMEM scratch.
# ---------------------------------------------------------------------------
def _make_lstm_ln_kernel(h_real, h_pad):
    def kernel(gx_ref, whh_hbm, h0_ref, c0_ref, gamma_ref, beta_ref,
               y_ref, h_sc, c_sc, w_sc, dma_sem):
        tt = pl.program_id(1)

        @pl.when(tt == 0)
        def _init():
            cp = pltpu.make_async_copy(whh_hbm, w_sc, dma_sem)
            cp.start()                                   # overlap with h/c init
            h_sc[...] = h0_ref[...].astype(jnp.float32)
            c_sc[...] = c0_ref[...].astype(jnp.float32)
            cp.wait()

        # Hoisted out of the unrolled time loop (JAX does not CSE broadcasts).
        gamma = gamma_ref[...]
        beta = beta_ref[...]
        inv_h = jnp.float32(1.0 / h_real)
        if h_real != h_pad:
            lane = jax.lax.broadcasted_iota(jnp.int32, (1, h_pad), 1)
            mask = lane < h_real
        tc = y_ref.shape[0]

        def step(i, carry):
            h, c = carry
            hm = h.astype(MATMUL_DTYPE)
            # One fused MXU push for all four gates (N = 4*Hp).
            gates = gx_ref[i].astype(jnp.float32) + jnp.dot(
                hm, w_sc[...], preferred_element_type=jnp.float32)
            i_g = jax.nn.sigmoid(gates[:, 0 * h_pad:1 * h_pad])
            f_g = jax.nn.sigmoid(gates[:, 1 * h_pad:2 * h_pad])
            g_g = jnp.tanh(gates[:, 2 * h_pad:3 * h_pad])
            o_g = jax.nn.sigmoid(gates[:, 3 * h_pad:4 * h_pad])
            c = f_g * c + i_g * g_g
            h = o_g * jnp.tanh(c)
            # Fused LayerNorm over the REAL hidden dim (padded lanes of h are
            # exactly 0 by construction: zero-padded weights/biases/state).
            mu = jnp.sum(h, axis=-1, keepdims=True) * inv_h
            cen = h - mu
            if h_real != h_pad:
                cen = jnp.where(mask, cen, 0.0)
            var = jnp.sum(cen * cen, axis=-1, keepdims=True) * inv_h
            y = cen * jax.lax.rsqrt(var + LN_EPS) * gamma + beta
            y_ref[i] = y.astype(y_ref.dtype)
            return (h, c)

        h, c = jax.lax.fori_loop(0, tc, step, (h_sc[...], c_sc[...]),
                                 unroll=True)
        h_sc[...] = h
        c_sc[...] = c

    return kernel


def lstm_ln_recurrence(gx, w_hh_p, h0, c0, gamma_p, beta_p, tc, H, H_pad):
    """gx: (T_pad, B_pad, 4*Hp) bf16; w_hh_p: (Hp, 4*Hp) bf16; h0/c0: (B_pad, Hp)
    f32; gamma/beta: (1, Hp) f32.  Returns LN(LSTM(x)) (T_pad, B_pad, Hp) bf16."""
    T_pad, B_pad, _ = gx.shape
    # Batch split only pays on 2-TensorCore parts (v7x); pure loss on v5e/v6e.
    bblk = B_pad // 2 if (_is_two_core_chip() and B_pad % 16 == 0) else B_pad
    n_bb, n_tt = B_pad // bblk, T_pad // tc

    pipelined = (tc * bblk * 4 * H_pad * 2      # gx block (bf16)
                 + tc * bblk * H_pad * 2        # y block (bf16)
                 + 2 * bblk * H_pad * 4         # h0, c0
                 + 2 * H_pad * 4)               # gamma, beta
    resident = H_pad * 4 * H_pad * 2 + 2 * bblk * H_pad * 4   # w_sc + h/c carry
    limit = _vmem_limit(pipelined, resident)
    # TODO(synk): for very large H, W_hh no longer fits VMEM resident; a K-tiled
    # recurrent matmul (or pltpu.matmul_push_rhs weight-stationary staging for
    # H<=256) would be the next step.

    return pl.pallas_call(
        _make_lstm_ln_kernel(H, H_pad),
        out_shape=jax.ShapeDtypeStruct((T_pad, B_pad, H_pad), ACT_DTYPE),
        grid_spec=pltpu.PrefetchScalarGridSpec(
            num_scalar_prefetch=0,
            grid=(n_bb, n_tt),
            in_specs=[
                pl.BlockSpec((tc, bblk, 4 * H_pad), lambda bb, tt: (tt, bb, 0)),
                pl.BlockSpec(memory_space=pl.ANY),        # W_hh^T stays in HBM
                pl.BlockSpec((bblk, H_pad), lambda bb, tt: (bb, 0)),
                pl.BlockSpec((bblk, H_pad), lambda bb, tt: (bb, 0)),
                pl.BlockSpec((1, H_pad), lambda bb, tt: (0, 0)),
                pl.BlockSpec((1, H_pad), lambda bb, tt: (0, 0)),
            ],
            out_specs=pl.BlockSpec((tc, bblk, H_pad), lambda bb, tt: (tt, bb, 0)),
            scratch_shapes=[
                pltpu.VMEM((bblk, H_pad), jnp.float32),       # h carry
                pltpu.VMEM((bblk, H_pad), jnp.float32),       # c carry
                pltpu.VMEM((H_pad, 4 * H_pad), MATMUL_DTYPE),  # resident W_hh^T
                pltpu.SemaphoreType.DMA(()),
            ],
        ),
        compiler_params=pltpu.CompilerParams(
            dimension_semantics=("parallel", "arbitrary"),
            vmem_limit_bytes=limit),
    )(gx, w_hh_p, h0, c0, gamma_p, beta_p)


# ---------------------------------------------------------------------------
# One-time weight packing (done at setup, NOT per forward call).
#   * PyTorch gate order (i, f, g, o); gate g occupies columns [g*Hp, g*Hp+H).
#   * Hidden dim padded to a multiple of 128 (lane-dense); pads are zero.
# ---------------------------------------------------------------------------
def prepare_params(params):
    layers = params["layers"]
    H = layers[0]["w_hh"].shape[1]
    H_pad = _round_up(H, 128)
    O = params["dense_w"].shape[0]
    O_pad = _round_up(O, 128)
    in_dim = layers[0]["w_ih"].shape[1]
    in_pad = _round_up(in_dim, 8)

    def pack_gates(w, d_in, d_pad):
        out = jnp.zeros((d_pad, 4 * H_pad), jnp.float32)
        for g in range(4):
            out = out.at[:d_in, g * H_pad:g * H_pad + H].set(
                jnp.transpose(w[g * H:(g + 1) * H, :]))
        return out.astype(MATMUL_DTYPE)

    def pack_bias(b):
        out = jnp.zeros((1, 4 * H_pad), jnp.float32)
        for g in range(4):
            out = out.at[0, g * H_pad:g * H_pad + H].set(b[g * H:(g + 1) * H])
        return out

    packed = {"layers": [], "H": H, "H_pad": H_pad, "O": O, "O_pad": O_pad,
              "in_dim": in_dim, "in_pad": in_pad}
    for i, lp in enumerate(layers):
        d_in = lp["w_ih"].shape[1]
        d_pad = in_pad if i == 0 else H_pad
        packed["layers"].append({
            "w_ih_p": pack_gates(lp["w_ih"], d_in, d_pad),
            "b_p": pack_bias(lp["b_ih"] + lp["b_hh"]),
            "w_hh_p": pack_gates(lp["w_hh"], H, H_pad),
            "gamma_p": jnp.zeros((1, H_pad), jnp.float32).at[0, :H].set(lp["ln_gamma"]),
            "beta_p": jnp.zeros((1, H_pad), jnp.float32).at[0, :H].set(lp["ln_beta"]),
        })
    packed["dense_w_p"] = (jnp.zeros((H_pad, O_pad), jnp.float32)
                           .at[:H, :O].set(jnp.transpose(params["dense_w"]))
                           .astype(MATMUL_DTYPE))
    packed["dense_b_p"] = (jnp.zeros((1, O_pad), jnp.float32)
                           .at[0, :O].set(params["dense_b"]))
    return packed


# ---------------------------------------------------------------------------
# Decoder forward (Pallas path).  x: (B, T, input_size) batch-first, as PyTorch.
# initial_state = (hx, cx), each (num_layers, B, H).
# ---------------------------------------------------------------------------
def decoder_forward(packed, x, initial_state):
    hx, cx = initial_state
    B, T, _ = x.shape
    H, H_pad, O = packed["H"], packed["H_pad"], packed["O"]
    I, I_pad = packed["in_dim"], packed["in_pad"]

    B_pad = max(_round_up(B, 8), 8)
    tc, T_pad = _time_chunk(T)

    x = jnp.pad(x, ((0, B_pad - B), (0, T_pad - T), (0, I_pad - I)))
    hx = jnp.pad(hx, ((0, 0), (0, B_pad - B), (0, H_pad - H))).astype(jnp.float32)
    cx = jnp.pad(cx, ((0, 0), (0, B_pad - B), (0, H_pad - H))).astype(jnp.float32)

    x_tm = jnp.transpose(x, (1, 0, 2))                    # (T_pad, B_pad, I_pad)
    for i, lp in enumerate(packed["layers"]):
        # 1) Hoisted, fully parallel input projection over the whole slab.
        gx = input_proj(x_tm.reshape(T_pad * B_pad, -1), lp["w_ih_p"], lp["b_p"])
        gx = gx.reshape(T_pad, B_pad, 4 * H_pad)          # free (t-major) reshape
        # 2) Serial recurrence + fused LayerNorm.
        x_tm = lstm_ln_recurrence(gx, lp["w_hh_p"], hx[i], cx[i],
                                  lp["gamma_p"], lp["beta_p"], tc, H, H_pad)
        # TODO(synk): on bandwidth-limited parts (v5e), fusing the input
        # projection into the recurrent kernel per time chunk (stream x, keep
        # W_ih resident) would remove the gx HBM round trip entirely.

    y2d = dense(x_tm.reshape(T_pad * B_pad, H_pad),
                packed["dense_w_p"], packed["dense_b_p"])
    y = jnp.transpose(y2d.reshape(T_pad, B_pad, -1), (1, 0, 2))
    return y[:B, :T, :O]                                   # (B, T, O)


# ---------------------------------------------------------------------------
# Pure-JAX f32 reference (mirrors PyTorch nn.LSTM / nn.LayerNorm / nn.Linear).
# ---------------------------------------------------------------------------
def ref_forward(params, x, initial_state):
    hx, cx = initial_state
    x_tm = jnp.transpose(x, (1, 0, 2))
    for i, lp in enumerate(params["layers"]):
        def step(carry, x_t, lp=lp):
            h, c = carry
            gates = (x_t @ lp["w_ih"].T + lp["b_ih"]
                     + h @ lp["w_hh"].T + lp["b_hh"])
            ig, fg, gg, og = jnp.split(gates, 4, axis=-1)
            c = jax.nn.sigmoid(fg) * c + jax.nn.sigmoid(ig) * jnp.tanh(gg)
            h = jax.nn.sigmoid(og) * jnp.tanh(c)
            return (h, c), h
        (_, _), hs = jax.lax.scan(step, (hx[i], cx[i]), x_tm)
        mu = jnp.mean(hs, axis=-1, keepdims=True)
        var = jnp.mean((hs - mu) ** 2, axis=-1, keepdims=True)
        x_tm = (hs - mu) * jax.lax.rsqrt(var + LN_EPS) * lp["ln_gamma"] + lp["ln_beta"]
    y_tm = x_tm @ params["dense_w"].T + params["dense_b"]
    return jnp.transpose(y_tm, (1, 0, 2))


# ---------------------------------------------------------------------------
def make_params(key, input_size, hidden_size, output_size, num_layers):
    params = {"layers": []}
    for i in range(num_layers):
        in_sz = input_size if i == 0 else hidden_size
        key, k1, k2, k3, k4 = jax.random.split(key, 5)
        params["layers"].append({
            "w_ih": 0.1 * jax.random.normal(k1, (4 * hidden_size, in_sz), jnp.float32),
            "w_hh": 0.1 * jax.random.normal(k2, (4 * hidden_size, hidden_size), jnp.float32),
            "b_ih": 0.1 * jax.random.normal(k3, (4 * hidden_size,), jnp.float32),
            "b_hh": 0.1 * jax.random.normal(k4, (4 * hidden_size,), jnp.float32),
            "ln_gamma": jnp.ones((hidden_size,), jnp.float32),
            "ln_beta": jnp.zeros((hidden_size,), jnp.float32),
        })
    key, k1, k2 = jax.random.split(key, 3)
    params["dense_w"] = 0.1 * jax.random.normal(k1, (output_size, hidden_size), jnp.float32)
    params["dense_b"] = 0.1 * jax.random.normal(k2, (output_size,), jnp.float32)
    return params


if __name__ == "__main__":
    B, T = 2, 8
    input_size, hidden_size, output_size, num_layers = 32, 32, 16, 2

    key = jax.random.PRNGKey(0)
    key, kx, kh, kc = jax.random.split(key, 4)
    params = make_params(key, input_size, hidden_size, output_size, num_layers)
    packed = prepare_params(params)          # one-time weight packing

    x = jax.random.normal(kx, (B, T, input_size), jnp.float32)
    hx = 0.1 * jax.random.normal(kh, (num_layers, B, hidden_size), jnp.float32)
    cx = 0.1 * jax.random.normal(kc, (num_layers, B, hidden_size), jnp.float32)

    out = decoder_forward(packed, x, (hx, cx))
    out = jax.block_until_ready(out)

    ref = ref_forward(params, x, (hx, cx))
    assert out.shape == (B, T, output_size), out.shape
    # bf16 MXU operands + bf16 stored activations vs. an f32 reference:
    # tolerance relaxed accordingly (expected precision change, not a bug).
    err = float(jnp.max(jnp.abs(out - ref)))
    assert jnp.allclose(out, ref, atol=5e-2, rtol=5e-2), err

    print("KERNEL_OK")
</pallas_src>

<mosaic_0001>
module attributes {stable_mosaic.version = 11 : i64} {
  func.func @matmul_bias_kernel(%arg0: i32, %arg1: i32, %arg2: memref<64x32xf32, #tpu.memory_space<vmem>>, %arg3: memref<32x512xbf16, #tpu.memory_space<vmem>>, %arg4: memref<1x512xf32, #tpu.memory_space<vmem>>, %arg5: memref<64x512xbf16, #tpu.memory_space<vmem>>) attributes {dimension_semantics = [#tpu.dimension_semantics<parallel>, #tpu.dimension_semantics<parallel>], iteration_bounds = array<i64: 1, 1>, scalar_prefetch = 0 : i64, scratch_operands = 0 : i64, tpu.core_type = #tpu.core_type<tc>, window_params = [{transform_indices = @transform_0, window_bounds = array<i64: 64, 32>}, {transform_indices = @transform_1, window_bounds = array<i64: 32, 512>}, {transform_indices = @transform_2, window_bounds = array<i64: 1, 512>}, {transform_indices = @transform_3, window_bounds = array<i64: 64, 512>}]} {
    %c0 = arith.constant 0 : index
    %c0_0 = arith.constant 0 : index
    %0 = vector.load %arg2[%c0, %c0_0] : memref<64x32xf32, #tpu.memory_space<vmem>>, vector<64x32xf32>
    %1 = arith.truncf %0 : vector<64x32xf32> to vector<64x32xbf16>
    %c0_1 = arith.constant 0 : index
    %c0_2 = arith.constant 0 : index
    %2 = vector.load %arg3[%c0_1, %c0_2] : memref<32x512xbf16, #tpu.memory_space<vmem>>, vector<32x512xbf16>
    %cst = arith.constant dense<0.000000e+00> : vector<64x512xf32>
    %3 = tpu.matmul %1, %2, %cst {dimension_numbers = #tpu.dot_dimension_numbers<[1], [0], [0], [1], [0, 0, 1, 1], [], []>} : vector<64x32xbf16>, vector<32x512xbf16>, vector<64x512xf32> -> vector<64x512xf32>
    %c0_3 = arith.constant 0 : index
    %c0_4 = arith.constant 0 : index
    %4 = vector.load %arg4[%c0_3, %c0_4] : memref<1x512xf32, #tpu.memory_space<vmem>>, vector<1x512xf32>
    %5 = vector.broadcast %4 : vector<1x512xf32> to vector<64x512xf32>
    %6 = arith.addf %3, %5 : vector<64x512xf32>
    %7 = arith.truncf %6 : vector<64x512xf32> to vector<64x512xbf16>
    %c0_5 = arith.constant 0 : index
    %c0_6 = arith.constant 0 : index
    %8 = vector.load %arg5[%c0_5, %c0_6] : memref<64x512xbf16, #tpu.memory_space<vmem>>, vector<64x512xbf16>
    tpu.vector_store %arg5[%c0_5, %c0_6], %7 {strides = array<i32>} : memref<64x512xbf16, #tpu.memory_space<vmem>>, vector<64x512xbf16>,
    return
  }
  func.func @transform_0(%arg0: i32, %arg1: i32) -> (i32, i32) {
    %c0_i32 = arith.constant 0 : i32
    %c0_i32_0 = arith.constant 0 : i32
    return %arg0, %c0_i32 : i32, i32
  }
  func.func @transform_1(%arg0: i32, %arg1: i32) -> (i32, i32) {
    %c0_i32 = arith.constant 0 : i32
    %c0_i32_0 = arith.constant 0 : i32
    return %c0_i32, %arg1 : i32, i32
  }
  func.func @transform_2(%arg0: i32, %arg1: i32) -> (i32, i32) {
    %c0_i32 = arith.constant 0 : i32
    %c0_i32_0 = arith.constant 0 : i32
    return %c0_i32, %arg1 : i32, i32
  }
  func.func @transform_3(%arg0: i32, %arg1: i32) -> (i32, i32) {
    %c0_i32 = arith.constant 0 : i32
    return %arg0, %arg1 : i32, i32
  }
}

</mosaic_0001>

<bundles_post_ra>
// kernel: tpu_custom_call.1
= control target key start
LH: loop header
LB: loop body
LE: loop exit
PB: predicated region body
PF: predicated region fallthrough
CT: control target
= control target key end

     0   :  { %v473_v2 = vmov 0   ;;  %vm98_vm0 = vcmask 261120   ;;  %s608_s0 = inlined_call_operand.vmem [shape: f32[64,32], index: 0, kind: input, shape index: {}]   ;;  %s609_s1 = inlined_call_operand.vmem [shape: bf16[32,512], index: 1, kind: input, shape index: {}]   ;;  %s610_s2 = inlined_call_operand.vmem [shape: f32[1,512], index: 2, kind: input, shape index: {}]   ;;  %s611_s3 = inlined_call_operand.hbm [shape: bf16[64,512], index: 3, kind: output, shape index: {}]  }
   0x1   :  { %v437_v0 = vld [vmem:[%s609_s1 + $0x4] ss:$16 sps:$4 sm:$0xff]   ;;  %v439_v1 = vld [vmem:[%s609_s1 + $0xc] ss:$16 sps:$4 sm:$0xff]   ;;  %143 = vmatprep.mubr.bf16.mxu0 %v473_v2  ;;  %216 = vmatprep.mubr.bf16.mxu1 %v473_v2  ;;  %v441_v3 = vld [vmem:[%s609_s1] ss:$16 sps:$4 sm:$0xff]  }
   0x2   :  { %111 = vmatprep.subr.bf16.mxu0 %v437_v0  ;;  %v442_v4 = vld [vmem:[%s609_s1 + $0x8] ss:$16 sps:$4 sm:$0xff]   ;;  %184 = vmatprep.subr.bf16.mxu1 %v439_v1  ;;  %v443_v5 = vld [vmem:[%s609_s1 + $0x24] ss:$16 sps:$4 sm:$0xff]   ;;  %v445_v6 = vld [vmem:[%s609_s1 + $0x2c] ss:$16 sps:$4 sm:$0xff]  }
   0x3   :  { %112 = vmatpush1.bf16.msra.mxu0 %v441_v3  ;;  %185 = vmatpush1.bf16.msra.mxu1 %v442_v4  ;;  %v447_v7 = vld [vmem:[%s609_s1 + $0x20] ss:$16 sps:$4 sm:$0xff]   ;;  %v448_v8 = vld [vmem:[%s609_s1 + $0x28] ss:$16 sps:$4 sm:$0xff]  }
   0x4   :  { %113 = vmatprep.subr.bf16.mxu0 %v443_v5  ;;  %v16_v9 = vld [vmem:[%s608_s0] sm:$0xff]  ;;  %v17_v10 = vld [vmem:[%s608_s0 + $0x8] sm:$0xff]  ;;  %186 = vmatprep.subr.bf16.mxu1 %v445_v6 }
   0x5   :  { %v24_v11 = vpack.c.bf16 %v17_v10, %v16_v9 }
   0x7   :  { %114 = vmatpush1.bf16.msra.mxu0 %v447_v7  ;;  %187 = vmatpush1.bf16.msra.mxu1 %v448_v8 }
   0x8   :  { %8 = vsyncpa [#allocation3], 0  ;;  %v18_v12 = vld [vmem:[%s608_s0 + $0x10] sm:$0xff]  ;;  %v19_v13 = vld [vmem:[%s608_s0 + $0x18] sm:$0xff]  ;;  %v38_v21 = vlaneseq }
   0x9   :  { %v25_v14 = vpack.c.bf16 %v19_v13, %v18_v12  ;;  %v20_v15 = vld [vmem:[%s608_s0 + $0x20] sm:$0xff]  ;;  %v21_v16 = vld [vmem:[%s608_s0 + $0x28] sm:$0xff]  ;;  %v22_v18 = vld [vmem:[%s608_s0 + $0x30] sm:$0xff] }
   0xa   :  { %393 = vmatmul.mubr.msk.bf16.vlgmr.msra.gmra.mrb[0].mxu0 %vm98_vm0, %v24_v11  ;;  %397 = vmatmul.mubr.msk.bf16.vlgmr.msra.gmra.mrb[0].mxu1 %vm98_vm0, %v24_v11  ;;  %v26_v17 = vpack.c.bf16 %v21_v16, %v20_v15  ;;  %v23_v19 = vld [vmem:[%s608_s0 + $0x38] sm:$0xff]  ;;  %v39_v22 = vshrl.u32 %v38_v21, 7  ;;  %v36_v25 = vld [vmem:[%s610_s2] sm:$0xf]  ;;  %s474_s0 = smov [#allocation2]  }
   0xb   :  { %153 = vmatprep.mubr.bf16.mxu0 %v473_v2  ;;  %226 = vmatprep.mubr.bf16.mxu1 %v473_v2  ;;  %v27_v20 = vpack.c.bf16 %v23_v19, %v22_v18  ;;  %s374_s2 = sshll.u32 %s474_s0, 4  ;;  %s375_s2 = int_to_ptr.vmem [resolvable:$true] %s374_s2 }
   0xc   :  { %v40_v23 = vsub.s32 0, %v39_v22  ;;  %v48_v24 = vsub.s32 2, %v39_v22  ;;  %v44_v26 = vsub.s32 1, %v39_v22  ;;  %v52_v27 = vsub.s32 3, %v39_v22  ;;  %s449_s18 = scalar_lea.vmem %s375_s2, 2048  ;;  %p454_p1 = scmp.lt.s32.totalorder %s375_s2, %s375_s2 }
   0xd   :  { %p450_p0 = scmp.ne.s32.totalorder %s375_s2, %s449_s18  ;;  %p455_p2 = scmp.lt.s32.totalorder %s449_s18, %s449_s18 }
   0xe   :  { %v556_v28 = vrot.slane %v36_v25, %v40_v23  ;;  %v558_v29 = vrot.slane %v36_v25, %v48_v24  ;;  %v560_v30 = vrot.slane %v36_v25, %v44_v26  ;;  %v562_v31 = vrot.slane %v36_v25, %v52_v27 }
   0xf   :  { %p456_p3 = por %p455_p2, %p454_p1 }
  0x11   :  { %p457_p4 = pnand %p456_p3, %p450_p0 }
  0x12   :  { %394 = vmatmul.mubr.msk.bf16.gmra.mrb[4].mxu0 %vm98_vm0, %v25_v14  ;;  %398 = vmatmul.mubr.msk.bf16.gmra.mrb[4].mxu1 %vm98_vm0, %v25_v14 }
  0x13   :  { %163 = vmatprep.mubr.bf16.mxu0 %v473_v2  ;;  %236 = vmatprep.mubr.bf16.mxu1 %v473_v2 }
  0x1a   :  { %395 = vmatmul.mubr.msk.bf16.gmra.mrb[8].mxu0 %vm98_vm0, %v26_v17  ;;  %399 = vmatmul.mubr.msk.bf16.gmra.mrb[8].mxu1 %vm98_vm0, %v26_v17 }
  0x1b   :  { %173 = vmatprep.mubr.bf16.mxu0 %v473_v2  ;;  %246 = vmatprep.mubr.bf16.mxu1 %v473_v2 }
  0x22   :  { %396 = vmatmul.mubr.msk.bf16.gmra.mrb[12].mxu0 %vm98_vm0, %v27_v20  ;;  %400 = vmatmul.mubr.msk.bf16.gmra.mrb[12].mxu1 %vm98_vm0, %v27_v20 }
  0xdd   :  { %v145_v32 = vpop.f32.mrb[0].mxu0  ;;  %v218_v33 = vpop.f32.mrb[0].mxu1 }
  0xde   :  { %v146_v34 = vadd.f32 %v145_v32, %v556_v28  ;;  %v219_v35 = vadd.f32 %v218_v33, %v558_v29  ;;  %v147_v36 = vpop.f32.mrb[1].mxu0  ;;  %v220_v37 = vpop.f32.mrb[1].mxu1 }
  0xdf   :  { %v148_v38 = vadd.f32 %v147_v36, %v560_v30  ;;  %v221_v39 = vadd.f32 %v220_v37, %v562_v31  ;;  %v149_v40 = vpop.f32.mrb[2].mxu0  ;;  %v222_v41 = vpop.f32.mrb[2].mxu1 }
  0xe0   :  { %v150_v42 = vadd.f32 %v149_v40, %v556_v28  ;;  %v223_v43 = vadd.f32 %v222_v41, %v558_v29  ;;  %v151_v44 = vpop.f32.mrb[3].mxu0  ;;  %v224_v45 = vpop.f32.mrb[3].mxu1 }
  0xe1   :  { %v417_v46 = vpack.c.bf16 %v148_v38, %v146_v34  ;;  %v418_v47 = vpack.c.bf16 %v221_v39, %v219_v35  ;;  %v152_v48 = vadd.f32 %v151_v44, %v560_v30  ;;  %v225_v49 = vadd.f32 %v224_v45, %v562_v31 }
  0xe3   :  { %353 = vst [vmem:[#allocation2] sm:$0xff] %v417_v46  ;;  %354 = vst [vmem:[#allocation2 + $0x8] sm:$0xff] %v418_v47  ;;  %v419_v50 = vpack.c.bf16 %v152_v48, %v150_v42  ;;  %v420_v51 = vpack.c.bf16 %v225_v49, %v223_v43 }
  0xe5   :  { %355 = vst [vmem:[#allocation2 + $0x10] sm:$0xff] %v419_v50  ;;  %356 = vst [vmem:[#allocation2 + $0x18] sm:$0xff] %v420_v51  ;;  %v155_v52 = vpop.f32.mrb[4].mxu0  ;;  %v228_v53 = vpop.f32.mrb[4].mxu1 }
  0xe6   :  { %v156_v54 = vadd.f32 %v155_v52, %v556_v28  ;;  %v229_v55 = vadd.f32 %v228_v53, %v558_v29  ;;  %v157_v56 = vpop.f32.mrb[5].mxu0  ;;  %v230_v57 = vpop.f32.mrb[5].mxu1 }
  0xe7   :  { %v158_v58 = vadd.f32 %v157_v56, %v560_v30  ;;  %v231_v59 = vadd.f32 %v230_v57, %v562_v31  ;;  %v159_v60 = vpop.f32.mrb[6].mxu0  ;;  %v232_v61 = vpop.f32.mrb[6].mxu1 }
  0xe8   :  { %v160_v62 = vadd.f32 %v159_v60, %v556_v28  ;;  %v233_v63 = vadd.f32 %v232_v61, %v558_v29  ;;  %v161_v0 = vpop.f32.mrb[7].mxu0  ;;  %v234_v1 = vpop.f32.mrb[7].mxu1 }
  0xe9   :  { %v421_v2 = vpack.c.bf16 %v158_v58, %v156_v54  ;;  %v422_v3 = vpack.c.bf16 %v231_v59, %v229_v55  ;;  %v162_v4 = vadd.f32 %v161_v0, %v560_v30  ;;  %v235_v5 = vadd.f32 %v234_v1, %v562_v31 }
  0xeb   :  { %357 = vst [vmem:[#allocation2 + $0x20] sm:$0xff] %v421_v2  ;;  %358 = vst [vmem:[#allocation2 + $0x28] sm:$0xff] %v422_v3  ;;  %v423_v6 = vpack.c.bf16 %v162_v4, %v160_v62  ;;  %v424_v7 = vpack.c.bf16 %v235_v5, %v233_v63 }
  0xed   :  { %359 = vst [vmem:[#allocation2 + $0x30] sm:$0xff] %v423_v6  ;;  %360 = vst [vmem:[#allocation2 + $0x38] sm:$0xff] %v424_v7  ;;  %v165_v8 = vpop.f32.mrb[8].mxu0  ;;  %v238_v9 = vpop.f32.mrb[8].mxu1 }
  0xee   :  { %v166_v10 = vadd.f32 %v165_v8, %v556_v28  ;;  %v239_v11 = vadd.f32 %v238_v9, %v558_v29  ;;  %v167_v12 = vpop.f32.mrb[9].mxu0  ;;  %v240_v13 = vpop.f32.mrb[9].mxu1 }
  0xef   :  { %v168_v14 = vadd.f32 %v167_v12, %v560_v30  ;;  %v241_v15 = vadd.f32 %v240_v13, %v562_v31  ;;  %v169_v16 = vpop.f32.mrb[10].mxu0  ;;  %v242_v17 = vpop.f32.mrb[10].mxu1 }
  0xf0   :  { %v170_v18 = vadd.f32 %v169_v16, %v556_v28  ;;  %v243_v19 = vadd.f32 %v242_v17, %v558_v29  ;;  %v171_v20 = vpop.f32.mrb[11].mxu0  ;;  %v244_v21 = vpop.f32.mrb[11].mxu1 }
  0xf1   :  { %v425_v22 = vpack.c.bf16 %v168_v14, %v166_v10  ;;  %v426_v23 = vpack.c.bf16 %v241_v15, %v239_v11  ;;  %v172_v24 = vadd.f32 %v171_v20, %v560_v30  ;;  %v245_v25 = vadd.f32 %v244_v21, %v562_v31 }
  0xf3   :  { %361 = vst [vmem:[#allocation2 + $0x40] sm:$0xff] %v425_v22  ;;  %362 = vst [vmem:[#allocation2 + $0x48] sm:$0xff] %v426_v23  ;;  %v427_v26 = vpack.c.bf16 %v172_v24, %v170_v18  ;;  %v428_v27 = vpack.c.bf16 %v245_v25, %v243_v19 }
  0xf5   :  { %363 = vst [vmem:[#allocation2 + $0x50] sm:$0xff] %v427_v26  ;;  %364 = vst [vmem:[#allocation2 + $0x58] sm:$0xff] %v428_v27  ;;  %v175_v32 = vpop.f32.mrb[12].mxu0  ;;  %v248_v33 = vpop.f32.mrb[12].mxu1 }
  0xf6   :  { %v176_v34 = vadd.f32 %v175_v32, %v556_v28  ;;  %v249_v35 = vadd.f32 %v248_v33, %v558_v29  ;;  %v177_v36 = vpop.f32.mrb[13].mxu0  ;;  %v250_v37 = vpop.f32.mrb[13].mxu1 }
  0xf7   :  { %v178_v38 = vadd.f32 %v177_v36, %v560_v30  ;;  %v251_v39 = vadd.f32 %v250_v37, %v562_v31  ;;  %v179_v40 = vpop.f32.mrb[14].mxu0  ;;  %v252_v41 = vpop.f32.mrb[14].mxu1 }
  0xf8   :  { %v180_v42 = vadd.f32 %v179_v40, %v556_v28  ;;  %v253_v43 = vadd.f32 %v252_v41, %v558_v29  ;;  %v181_v44 = vpop.f32.mrb[15].mxu0  ;;  %v254_v45 = vpop.f32.mrb[15].mxu1 }
  0xf9   :  { %v429_v46 = vpack.c.bf16 %v178_v38, %v176_v34  ;;  %v430_v47 = vpack.c.bf16 %v251_v39, %v249_v35  ;;  %v182_v48 = vadd.f32 %v181_v44, %v560_v30  ;;  %v255_v49 = vadd.f32 %v254_v45, %v562_v31 }
  0xfb   :  { %365 = vst [vmem:[#allocation2 + $0x60] sm:$0xff] %v429_v46  ;;  %366 = vst [vmem:[#allocation2 + $0x68] sm:$0xff] %v430_v47  ;;  %v431_v50 = vpack.c.bf16 %v182_v48, %v180_v42  ;;  %v432_v51 = vpack.c.bf16 %v255_v49, %v253_v43 }
  0xfd   :  { %367 = vst [vmem:[#allocation2 + $0x70] sm:$0xff] %v431_v50  ;;  %368 = vst [vmem:[#allocation2 + $0x78] sm:$0xff] %v432_v51 }
  0xfe   :  { %460 = shalt.err (!%p457_p4)
}
  0xff   :  { %s461_s21 = scalar_lea.hbm %s611_s3, 2048 }
 0x100   :  { %p462_p5 = scmp.ne.s32.totalorder %s611_s3, %s461_s21  ;;  %p465_p6 = scmp.lt.u32.totalorder %s461_s21, %s611_s3 }
 0x102   :  { %p467_p7 = pnand %p465_p6, %p462_p5 }
 0x104   :  { %470 = shalt.err (!%p467_p7)
}
 0x105   :  { %s475_s26 = smov 256   ;;  %s476_s27 = smov 16  }
 0x106   :  { %380 = dma.vmem_to_hbm [thread:$0]  %s375_s2, 2048, %s611_s3, [#allocation3], %s475_s26, %s475_s26, %s476_s27  }
 0x107   :  { %471 = dma.done.wait [#allocation3], 2048  }
 0x108   :  { %472 = vsyncadd [#allocation3], 4294965248 }
 0x109   :  { %384 = vsyncpa [#allocation3], 1 }

</bundles_post_ra>
